<compile_context>
chip_gen: v5e
topology: v5e:2x2
jax: 0.10.0
libtpu: 0.0.40
codegen_flags: <defaults>
</compile_context>

<pallas_src>
import math

import jax
import jax.numpy as jnp
from jax import lax
from jax.experimental import pallas as pl
from jax.experimental.pallas import tpu as pltpu


_INV_SQRT2 = 1.0 / math.sqrt(2.0)


def _vqa_head_kernel(x_ref, wenc_ref, benc_ref,
                     w1_ref, b1_ref, gamma_ref, beta_ref,
                     w2_ref, b2_ref,
                     out_ref, h_ref):
    """Grid = (batch tiles, answer tiles).

    j == 0: stand-in encoder (pooled-feature projection + tanh pooler) and the
    logit_fc prefix Linear -> GeLU(erf) -> LayerNorm, cached in VMEM scratch
    (bf16) and reused for every answer tile of this batch tile.
    Every (i, j): classifier matmul into one lane-dense answer tile.
    """
    j = pl.program_id(1)

    @pl.when(j == 0)
    def _prefix():
        # stand-in encoder: [mean_o(feat), mean_o(pos)] @ [Wf; Wp] + b -> tanh
        proj = jnp.dot(x_ref[...], wenc_ref[...],
                       preferred_element_type=jnp.float32)        # (TB, hid) f32
        xp = jnp.tanh(proj + benc_ref[...])

        # logit_fc prefix: Linear(hid -> 2*hid) + GeLU(erf) + LayerNorm(1e-12)
        h = jnp.dot(xp.astype(jnp.bfloat16), w1_ref[...],
                    preferred_element_type=jnp.float32) + b1_ref[...]
        h = 0.5 * h * (1.0 + lax.erf(h * _INV_SQRT2))
        # one-pass moments; clamp var >= 0 before rsqrt (cancellation safety)
        mu = jnp.mean(h, axis=-1, keepdims=True)
        ex2 = jnp.mean(h * h, axis=-1, keepdims=True)
        var = jnp.maximum(ex2 - mu * mu, 0.0)
        h = (h - mu) * lax.rsqrt(var + 1e-12)
        h = h * gamma_ref[...] + beta_ref[...]
        h_ref[...] = h.astype(jnp.bfloat16)                        # (TB, 2*hid)

    # classifier Linear(2*hid -> tn): bf16 MXU inputs, f32 accumulation/logits
    out_ref[...] = (jnp.dot(h_ref[...], w2_ref[...],
                            preferred_element_type=jnp.float32)
                    + b2_ref[...])


def _round_up(x, m):
    return (x + m - 1) // m * m


_W2_RESIDENT_BYTES = 10 * 1024 * 1024    # keep w2 fully resident below this
_VMEM_LIMIT_BYTES = 48 * 1024 * 1024     # headroom vs v7x's 64 MiB physical


def vqa_forward(feat, pos, params, *, tb=256):
    b, o, f = feat.shape
    hid = params["wf"].shape[1]
    num_answers = params["w2"].shape[1]

    # ---- wrapper-side prep (trivial XLA ops vs the matmuls) ----------------
    # Object mean-pool hoisted out of the kernel; pos folded into feat so the
    # encoder projection is one MXU matmul with a 128-aligned contraction dim.
    feat_mean = jnp.mean(feat, axis=1)                         # (b, f)
    pos_mean = jnp.mean(pos, axis=1)                           # (b, 4)
    x_in = jnp.concatenate([feat_mean, pos_mean], axis=-1)     # (b, f+4)
    wenc = jnp.concatenate([params["wf"].astype(jnp.float32),
                            params["wp"].astype(jnp.float32)], axis=0)

    k = f + 4
    k_pad = _round_up(k, 128)
    x_in = jnp.pad(x_in, ((0, 0), (0, k_pad - k))).astype(jnp.bfloat16)
    wenc = jnp.pad(wenc, ((0, k_pad - k), (0, 0))).astype(jnp.bfloat16)

    # ---- batch tiling: >= 2 tiles when batch allows (megacore on v7x) ------
    tb = min(tb, _round_up(b, 8))
    if b >= 16:
        tb = min(tb, _round_up(-(-b // 2), 8))
    b_pad = _round_up(b, tb)
    x_p = jnp.pad(x_in, ((0, b_pad - b), (0, 0)))

    # ---- answer tiling: w2 resident when it fits, minimal 128-padding ------
    n128 = _round_up(num_answers, 128)
    w2_bytes = 2 * hid * n128 * 2                              # bf16 bytes
    if w2_bytes <= _W2_RESIDENT_BYTES:
        tn = n128                                              # single, resident tile
    else:
        n_tiles = -(-w2_bytes // _W2_RESIDENT_BYTES)
        tn = _round_up(-(-n128 // n_tiles), 128)
    n_pad = _round_up(n128, tn)
    single_n = (n_pad // tn) == 1

    w2_p = jnp.pad(params["w2"].astype(jnp.bfloat16),
                   ((0, 0), (0, n_pad - num_answers)))
    b2_p = jnp.pad(params["b2"].astype(jnp.float32),
                   ((0, 0), (0, n_pad - num_answers)))

    grid = (b_pad // tb, n_pad // tn)

    def _build(resident_mode):
        rk = {} if resident_mode is None else {"pipeline_mode": resident_mode}
        in_specs = [
            # batch-blocked pooled activations
            pl.BlockSpec((tb, k_pad), lambda i, j: (i, 0)),
            # resident weights: constant index_map -> fetched once, stay in VMEM
            pl.BlockSpec((k_pad, hid), lambda i, j: (0, 0), **rk),
            pl.BlockSpec((1, hid), lambda i, j: (0, 0), **rk),
            pl.BlockSpec((hid, 2 * hid), lambda i, j: (0, 0), **rk),
            pl.BlockSpec((1, 2 * hid), lambda i, j: (0, 0), **rk),
            pl.BlockSpec((1, 2 * hid), lambda i, j: (0, 0), **rk),
            pl.BlockSpec((1, 2 * hid), lambda i, j: (0, 0), **rk),
        ]
        if single_n:
            # classifier weights fully resident too
            in_specs += [
                pl.BlockSpec((2 * hid, tn), lambda i, j: (0, 0), **rk),
                pl.BlockSpec((1, tn), lambda i, j: (0, 0), **rk),
            ]
        else:
            # fall back to answer-blocked streaming for very large vocabularies
            in_specs += [
                pl.BlockSpec((2 * hid, tn), lambda i, j: (0, j)),
                pl.BlockSpec((1, tn), lambda i, j: (0, j)),
            ]
        return pl.pallas_call(
            _vqa_head_kernel,
            out_shape=jax.ShapeDtypeStruct((b_pad, n_pad), jnp.float32),
            grid_spec=pltpu.PrefetchScalarGridSpec(
                num_scalar_prefetch=0,
                grid=grid,
                in_specs=in_specs,
                out_specs=pl.BlockSpec((tb, tn), lambda i, j: (i, j)),
                scratch_shapes=[pltpu.VMEM((tb, 2 * hid), jnp.bfloat16)],
            ),
            compiler_params=pltpu.CompilerParams(
                dimension_semantics=("parallel", "arbitrary"),
                vmem_limit_bytes=_VMEM_LIMIT_BYTES,
            ),
        )

    args = (x_p, wenc,
            params["benc"], params["w1"], params["b1"],
            params["gamma"], params["beta"], w2_p, b2_p)
    try:
        # single-buffer the constant-index weights (reclaims VMEM on v7x)
        out = _build(pl.Buffered(1))(*args)
    except Exception:
        # older JAX without per-operand buffer counts: default double-buffering
        out = _build(None)(*args)

    return out[:b, :num_answers]


def init_params(key, f, hid, num_answers):
    """BERT-style init: weights ~ N(0, 0.02), biases 0, LN gamma=1 beta=0.

    NOTE: weights are stored (in, out); weights imported from a PyTorch
    nn.Linear checkpoint ((out, in)) must be transposed first.
    """
    ks = jax.random.split(key, 4)
    std = 0.02
    return {
        "wf": std * jax.random.normal(ks[0], (f, hid), jnp.float32),
        "wp": std * jax.random.normal(ks[1], (4, hid), jnp.float32),
        "benc": jnp.zeros((1, hid), jnp.float32),
        "w1": (std * jax.random.normal(ks[2], (hid, 2 * hid), jnp.float32)).astype(jnp.bfloat16),
        "b1": jnp.zeros((1, 2 * hid), jnp.float32),
        "gamma": jnp.ones((1, 2 * hid), jnp.float32),
        "beta": jnp.zeros((1, 2 * hid), jnp.float32),
        "w2": (std * jax.random.normal(ks[3], (2 * hid, num_answers), jnp.float32)).astype(jnp.bfloat16),
        "b2": jnp.zeros((1, num_answers), jnp.float32),
    }


def reference_forward(feat, pos, p):
    """Pure-JAX reference (same precision choices as the kernel)."""
    feat_mean = jnp.mean(feat, axis=1)
    pos_mean = jnp.mean(pos, axis=1)
    x = jnp.concatenate([feat_mean, pos_mean], axis=-1).astype(jnp.bfloat16)
    wenc = jnp.concatenate([p["wf"].astype(jnp.float32),
                            p["wp"].astype(jnp.float32)], axis=0).astype(jnp.bfloat16)
    xp = jnp.tanh(jnp.dot(x, wenc, preferred_element_type=jnp.float32) + p["benc"])
    h = jnp.dot(xp.astype(jnp.bfloat16), p["w1"],
                preferred_element_type=jnp.float32) + p["b1"]
    h = 0.5 * h * (1.0 + lax.erf(h / math.sqrt(2.0)))
    mu = jnp.mean(h, -1, keepdims=True)
    var = jnp.mean((h - mu) ** 2, -1, keepdims=True)
    h = (h - mu) * lax.rsqrt(var + 1e-12) * p["gamma"] + p["beta"]
    return jnp.dot(h.astype(jnp.bfloat16), p["w2"],
                   preferred_element_type=jnp.float32) + p["b2"]


if __name__ == "__main__":
    # small shapes: batch=2, objects=8, visual_feat=32, hidden=32, answers=16
    b, o, f, hid, num_answers = 2, 8, 32, 32, 16

    key = jax.random.PRNGKey(0)
    k_feat, k_pos, k_params = jax.random.split(key, 3)
    feat = jax.random.normal(k_feat, (b, o, f), jnp.float32)
    pos = jax.random.uniform(k_pos, (b, o, 4), jnp.float32)
    params = init_params(k_params, f, hid, num_answers)

    logits = jax.block_until_ready(vqa_forward(feat, pos, params))
    ref = reference_forward(feat, pos, params)

    assert logits.shape == (b, num_answers)
    assert jnp.allclose(logits, ref, atol=5e-3, rtol=5e-3), "mismatch vs reference"

    print("KERNEL_OK")
</pallas_src>

<mosaic_0001>
module attributes {stable_mosaic.version = 11 : i64} {
  func.func @_vqa_head_kernel(%arg0: i32, %arg1: i32, %arg2: memref<8x128xbf16, #tpu.memory_space<vmem>>, %arg3: memref<128x32xbf16, #tpu.memory_space<vmem>>, %arg4: memref<1x32xf32, #tpu.memory_space<vmem>>, %arg5: memref<32x64xbf16, #tpu.memory_space<vmem>>, %arg6: memref<1x64xf32, #tpu.memory_space<vmem>>, %arg7: memref<1x64xf32, #tpu.memory_space<vmem>>, %arg8: memref<1x64xf32, #tpu.memory_space<vmem>>, %arg9: memref<64x128xbf16, #tpu.memory_space<vmem>>, %arg10: memref<1x128xf32, #tpu.memory_space<vmem>>, %arg11: memref<8x128xf32, #tpu.memory_space<vmem>>, %arg12: memref<8x64xbf16, #tpu.memory_space<vmem>>) attributes {dimension_semantics = [#tpu.dimension_semantics<parallel>, #tpu.dimension_semantics<arbitrary>], iteration_bounds = array<i64: 1, 1>, scalar_prefetch = 0 : i64, scratch_operands = 1 : i64, tpu.core_type = #tpu.core_type<tc>, window_params = [{transform_indices = @transform_0, window_bounds = array<i64: 8, 128>}, {pipeline_mode = #tpu.pipeline_mode<synchronous>, transform_indices = @transform_1, window_bounds = array<i64: 128, 32>}, {pipeline_mode = #tpu.pipeline_mode<synchronous>, transform_indices = @transform_2, window_bounds = array<i64: 1, 32>}, {pipeline_mode = #tpu.pipeline_mode<synchronous>, transform_indices = @transform_3, window_bounds = array<i64: 32, 64>}, {pipeline_mode = #tpu.pipeline_mode<synchronous>, transform_indices = @transform_4, window_bounds = array<i64: 1, 64>}, {pipeline_mode = #tpu.pipeline_mode<synchronous>, transform_indices = @transform_5, window_bounds = array<i64: 1, 64>}, {pipeline_mode = #tpu.pipeline_mode<synchronous>, transform_indices = @transform_6, window_bounds = array<i64: 1, 64>}, {pipeline_mode = #tpu.pipeline_mode<synchronous>, transform_indices = @transform_7, window_bounds = array<i64: 64, 128>}, {pipeline_mode = #tpu.pipeline_mode<synchronous>, transform_indices = @transform_8, window_bounds = array<i64: 1, 128>}, {transform_indices = @transform_9, window_bounds = array<i64: 8, 128>}]} {
    %c0_i32 = arith.constant 0 : i32
    %0 = arith.cmpi eq, %arg1, %c0_i32 : i32
    %1 = arith.extui %0 : i1 to i32
    %c0_i32_0 = arith.constant 0 : i32
    %2 = arith.cmpi ne, %1, %c0_i32_0 : i32
    scf.if %2 {
      %c0_8 = arith.constant 0 : index
      %c0_9 = arith.constant 0 : index
      %10 = vector.load %arg2[%c0_8, %c0_9] : memref<8x128xbf16, #tpu.memory_space<vmem>>, vector<8x128xbf16>
      %c0_10 = arith.constant 0 : index
      %c0_11 = arith.constant 0 : index
      %11 = vector.load %arg3[%c0_10, %c0_11] : memref<128x32xbf16, #tpu.memory_space<vmem>>, vector<128x32xbf16>
      %cst_12 = arith.constant dense<0.000000e+00> : vector<8x32xf32>
      %12 = tpu.matmul %10, %11, %cst_12 {dimension_numbers = #tpu.dot_dimension_numbers<[1], [0], [0], [1], [0, 0, 1, 1], [], []>} : vector<8x128xbf16>, vector<128x32xbf16>, vector<8x32xf32> -> vector<8x32xf32>
      %c0_13 = arith.constant 0 : index
      %c0_14 = arith.constant 0 : index
      %13 = vector.load %arg4[%c0_13, %c0_14] : memref<1x32xf32, #tpu.memory_space<vmem>>, vector<1x32xf32>
      %14 = vector.broadcast %13 : vector<1x32xf32> to vector<8x32xf32>
      %15 = arith.addf %12, %14 : vector<8x32xf32>
      %16 = math.tanh %15 : vector<8x32xf32>
      %17 = arith.truncf %16 : vector<8x32xf32> to vector<8x32xbf16>
      %c0_15 = arith.constant 0 : index
      %c0_16 = arith.constant 0 : index
      %18 = vector.load %arg5[%c0_15, %c0_16] : memref<32x64xbf16, #tpu.memory_space<vmem>>, vector<32x64xbf16>
      %cst_17 = arith.constant dense<0.000000e+00> : vector<8x64xf32>
      %19 = tpu.matmul %17, %18, %cst_17 {dimension_numbers = #tpu.dot_dimension_numbers<[1], [0], [0], [1], [0, 0, 1, 1], [], []>} : vector<8x32xbf16>, vector<32x64xbf16>, vector<8x64xf32> -> vector<8x64xf32>
      %c0_18 = arith.constant 0 : index
      %c0_19 = arith.constant 0 : index
      %20 = vector.load %arg6[%c0_18, %c0_19] : memref<1x64xf32, #tpu.memory_space<vmem>>, vector<1x64xf32>
      %21 = vector.broadcast %20 : vector<1x64xf32> to vector<8x64xf32>
      %22 = arith.addf %19, %21 : vector<8x64xf32>
      %cst_20 = arith.constant 5.000000e-01 : f32
      %23 = vector.broadcast %cst_20 : f32 to vector<8x64xf32>
      %24 = arith.mulf %23, %22 : vector<8x64xf32>
      %cst_21 = arith.constant 0.707106769 : f32
      %25 = vector.broadcast %cst_21 : f32 to vector<8x64xf32>
      %26 = arith.mulf %22, %25 : vector<8x64xf32>
      %27 = math.erf %26 : vector<8x64xf32>
      %cst_22 = arith.constant 1.000000e+00 : f32
      %28 = vector.broadcast %cst_22 : f32 to vector<8x64xf32>
      %29 = arith.addf %28, %27 : vector<8x64xf32>
      %30 = arith.mulf %24, %29 : vector<8x64xf32>
      %cst_23 = arith.constant dense<0.000000e+00> : vector<8xf32>
      %31 = vector.multi_reduction <add>, %30, %cst_23 [1] : vector<8x64xf32> to vector<8xf32>
      %32 = vector.shape_cast %31 : vector<8xf32> to vector<8x1xf32>
      %cst_24 = arith.constant 6.400000e+01 : f32
      %33 = vector.broadcast %cst_24 : f32 to vector<8x1xf32>
      %34 = arith.divf %32, %33 : vector<8x1xf32>
      %35 = arith.mulf %30, %30 : vector<8x64xf32>
      %cst_25 = arith.constant dense<0.000000e+00> : vector<8xf32>
      %36 = vector.multi_reduction <add>, %35, %cst_25 [1] : vector<8x64xf32> to vector<8xf32>
      %37 = vector.shape_cast %36 : vector<8xf32> to vector<8x1xf32>
      %cst_26 = arith.constant 6.400000e+01 : f32
      %38 = vector.broadcast %cst_26 : f32 to vector<8x1xf32>
      %39 = arith.divf %37, %38 : vector<8x1xf32>
      %40 = arith.mulf %34, %34 : vector<8x1xf32>
      %41 = arith.subf %39, %40 : vector<8x1xf32>
      %cst_27 = arith.constant 0.000000e+00 : f32
      %42 = vector.broadcast %cst_27 : f32 to vector<8x1xf32>
      %43 = arith.maximumf %41, %42 : vector<8x1xf32>
      %44 = vector.broadcast %34 : vector<8x1xf32> to vector<8x64xf32>
      %45 = arith.subf %30, %44 : vector<8x64xf32>
      %cst_28 = arith.constant 9.99999996E-13 : f32
      %46 = vector.broadcast %cst_28 : f32 to vector<8x1xf32>
      %47 = arith.addf %43, %46 : vector<8x1xf32>
      %48 = math.rsqrt %47 : vector<8x1xf32>
      %49 = vector.broadcast %48 : vector<8x1xf32> to vector<8x64xf32>
      %50 = arith.mulf %45, %49 : vector<8x64xf32>
      %c0_29 = arith.constant 0 : index
      %c0_30 = arith.constant 0 : index
      %51 = vector.load %arg7[%c0_29, %c0_30] : memref<1x64xf32, #tpu.memory_space<vmem>>, vector<1x64xf32>
      %52 = vector.broadcast %51 : vector<1x64xf32> to vector<8x64xf32>
      %53 = arith.mulf %50, %52 : vector<8x64xf32>
      %c0_31 = arith.constant 0 : index
      %c0_32 = arith.constant 0 : index
      %54 = vector.load %arg8[%c0_31, %c0_32] : memref<1x64xf32, #tpu.memory_space<vmem>>, vector<1x64xf32>
      %55 = vector.broadcast %54 : vector<1x64xf32> to vector<8x64xf32>
      %56 = arith.addf %53, %55 : vector<8x64xf32>
      %57 = arith.truncf %56 : vector<8x64xf32> to vector<8x64xbf16>
      %c0_33 = arith.constant 0 : index
      %c0_34 = arith.constant 0 : index
      %58 = vector.load %arg12[%c0_33, %c0_34] : memref<8x64xbf16, #tpu.memory_space<vmem>>, vector<8x64xbf16>
      tpu.vector_store %arg12[%c0_33, %c0_34], %57 {strides = array<i32>} : memref<8x64xbf16, #tpu.memory_space<vmem>>, vector<8x64xbf16>,
    } else {
    }
    %c0 = arith.constant 0 : index
    %c0_1 = arith.constant 0 : index
    %3 = vector.load %arg12[%c0, %c0_1] : memref<8x64xbf16, #tpu.memory_space<vmem>>, vector<8x64xbf16>
    %c0_2 = arith.constant 0 : index
    %c0_3 = arith.constant 0 : index
    %4 = vector.load %arg9[%c0_2, %c0_3] : memref<64x128xbf16, #tpu.memory_space<vmem>>, vector<64x128xbf16>
    %cst = arith.constant dense<0.000000e+00> : vector<8x128xf32>
    %5 = tpu.matmul %3, %4, %cst {dimension_numbers = #tpu.dot_dimension_numbers<[1], [0], [0], [1], [0, 0, 1, 1], [], []>} : vector<8x64xbf16>, vector<64x128xbf16>, vector<8x128xf32> -> vector<8x128xf32>
    %c0_4 = arith.constant 0 : index
    %c0_5 = arith.constant 0 : index
    %6 = vector.load %arg10[%c0_4, %c0_5] : memref<1x128xf32, #tpu.memory_space<vmem>>, vector<1x128xf32>
    %7 = vector.broadcast %6 : vector<1x128xf32> to vector<8x128xf32>
    %8 = arith.addf %5, %7 : vector<8x128xf32>
    %c0_6 = arith.constant 0 : index
    %c0_7 = arith.constant 0 : index
    %9 = vector.load %arg11[%c0_6, %c0_7] : memref<8x128xf32, #tpu.memory_space<vmem>>, vector<8x128xf32>
    tpu.vector_store %arg11[%c0_6, %c0_7], %8 {strides = array<i32>} : memref<8x128xf32, #tpu.memory_space<vmem>>, vector<8x128xf32>,
    return
  }
  func.func @transform_0(%arg0: i32, %arg1: i32) -> (i32, i32) {
    %c0_i32 = arith.constant 0 : i32
    %c0_i32_0 = arith.constant 0 : i32
    return %arg0, %c0_i32 : i32, i32
  }
  func.func @transform_1(%arg0: i32, %arg1: i32) -> (i32, i32) {
    %c0_i32 = arith.constant 0 : i32
    %c0_i32_0 = arith.constant 0 : i32
    %c0_i32_1 = arith.constant 0 : i32
    return %c0_i32, %c0_i32_0 : i32, i32
  }
  func.func @transform_2(%arg0: i32, %arg1: i32) -> (i32, i32) {
    %c0_i32 = arith.constant 0 : i32
    %c0_i32_0 = arith.constant 0 : i32
    %c0_i32_1 = arith.constant 0 : i32
    return %c0_i32, %c0_i32_0 : i32, i32
  }
  func.func @transform_3(%arg0: i32, %arg1: i32) -> (i32, i32) {
    %c0_i32 = arith.constant 0 : i32
    %c0_i32_0 = arith.constant 0 : i32
    %c0_i32_1 = arith.constant 0 : i32
    return %c0_i32, %c0_i32_0 : i32, i32
  }
  func.func @transform_4(%arg0: i32, %arg1: i32) -> (i32, i32) {
    %c0_i32 = arith.constant 0 : i32
    %c0_i32_0 = arith.constant 0 : i32
    %c0_i32_1 = arith.constant 0 : i32
    return %c0_i32, %c0_i32_0 : i32, i32
  }
  func.func @transform_5(%arg0: i32, %arg1: i32) -> (i32, i32) {
    %c0_i32 = arith.constant 0 : i32
    %c0_i32_0 = arith.constant 0 : i32
    %c0_i32_1 = arith.constant 0 : i32
    return %c0_i32, %c0_i32_0 : i32, i32
  }
  func.func @transform_6(%arg0: i32, %arg1: i32) -> (i32, i32) {
    %c0_i32 = arith.constant 0 : i32
    %c0_i32_0 = arith.constant 0 : i32
    %c0_i32_1 = arith.constant 0 : i32
    return %c0_i32, %c0_i32_0 : i32, i32
  }
  func.func @transform_7(%arg0: i32, %arg1: i32) -> (i32, i32) {
    %c0_i32 = arith.constant 0 : i32
    %c0_i32_0 = arith.constant 0 : i32
    %c0_i32_1 = arith.constant 0 : i32
    return %c0_i32, %c0_i32_0 : i32, i32
  }
  func.func @transform_8(%arg0: i32, %arg1: i32) -> (i32, i32) {
    %c0_i32 = arith.constant 0 : i32
    %c0_i32_0 = arith.constant 0 : i32
    %c0_i32_1 = arith.constant 0 : i32
    return %c0_i32, %c0_i32_0 : i32, i32
  }
  func.func @transform_9(%arg0: i32, %arg1: i32) -> (i32, i32) {
    %c0_i32 = arith.constant 0 : i32
    return %arg0, %arg1 : i32, i32
  }
}

module attributes {stable_mosaic.version = 11 : i64} {
  func.func @_vqa_head_kernel(%arg0: i32, %arg1: i32, %arg2: memref<8x128xbf16, #tpu.memory_space<vmem>>, %arg3: memref<128x32xbf16, #tpu.memory_space<vmem>>, %arg4: memref<1x32xf32, #tpu.memory_space<vmem>>, %arg5: memref<32x64xbf16, #tpu.memory_space<vmem>>, %arg6: memref<1x64xf32, #tpu.memory_space<vmem>>, %arg7: memref<1x64xf32, #tpu.memory_space<vmem>>, %arg8: memref<1x64xf32, #tpu.memory_space<vmem>>, %arg9: memref<64x128xbf16, #tpu.memory_space<vmem>>, %arg10: memref<1x128xf32, #tpu.memory_space<vmem>>, %arg11: memref<8x128xf32, #tpu.memory_space<vmem>>, %arg12: memref<8x64xbf16, #tpu.memory_space<vmem>>) attributes {dimension_semantics = [#tpu.dimension_semantics<parallel>, #tpu.dimension_semantics<arbitrary>], iteration_bounds = array<i64: 1, 1>, scalar_prefetch = 0 : i64, scratch_operands = 1 : i64, tpu.core_type = #tpu.core_type<tc>, window_params = [{transform_indices = @transform_0, window_bounds = array<i64: 8, 128>}, {pipeline_mode = #tpu.pipeline_mode<synchronous>, transform_indices = @transform_1, window_bounds = array<i64: 128, 32>}, {pipeline_mode = #tpu.pipeline_mode<synchronous>, transform_indices = @transform_2, window_bounds = array<i64: 1, 32>}, {pipeline_mode = #tpu.pipeline_mode<synchronous>, transform_indices = @transform_3, window_bounds = array<i64: 32, 64>}, {pipeline_mode = #tpu.pipeline_mode<synchronous>, transform_indices = @transform_4, window_bounds = array<i64: 1, 64>}, {pipeline_mode = #tpu.pipeline_mode<synchronous>, transform_indices = @transform_5, window_bounds = array<i64: 1, 64>}, {pipeline_mode = #tpu.pipeline_mode<synchronous>, transform_indices = @transform_6, window_bounds = array<i64: 1, 64>}, {pipeline_mode = #tpu.pipeline_mode<synchronous>, transform_indices = @transform_7, window_bounds = array<i64: 64, 128>}, {pipeline_mode = #tpu.pipeline_mode<synchronous>, transform_indices = @transform_8, window_bounds = array<i64: 1, 128>}, {transform_indices = @transform_9, window_bounds = array<i64: 8, 128>}]} {
    %c0_i32 = arith.constant 0 : i32
    %0 = arith.cmpi eq, %arg1, %c0_i32 : i32
    %1 = arith.extui %0 : i1 to i32
    %c0_i32_0 = arith.constant 0 : i32
    %2 = arith.cmpi ne, %1, %c0_i32_0 : i32
    scf.if %2 {
      %c0_8 = arith.constant 0 : index
      %c0_9 = arith.constant 0 : index
      %10 = vector.load %arg2[%c0_8, %c0_9] : memref<8x128xbf16, #tpu.memory_space<vmem>>, vector<8x128xbf16>
      %c0_10 = arith.constant 0 : index
      %c0_11 = arith.constant 0 : index
      %11 = vector.load %arg3[%c0_10, %c0_11] : memref<128x32xbf16, #tpu.memory_space<vmem>>, vector<128x32xbf16>
      %cst_12 = arith.constant dense<0.000000e+00> : vector<8x32xf32>
      %12 = tpu.matmul %10, %11, %cst_12 {dimension_numbers = #tpu.dot_dimension_numbers<[1], [0], [0], [1], [0, 0, 1, 1], [], []>} : vector<8x128xbf16>, vector<128x32xbf16>, vector<8x32xf32> -> vector<8x32xf32>
      %c0_13 = arith.constant 0 : index
      %c0_14 = arith.constant 0 : index
      %13 = vector.load %arg4[%c0_13, %c0_14] : memref<1x32xf32, #tpu.memory_space<vmem>>, vector<1x32xf32>
      %14 = vector.broadcast %13 : vector<1x32xf32> to vector<8x32xf32>
      %15 = arith.addf %12, %14 : vector<8x32xf32>
      %16 = math.tanh %15 : vector<8x32xf32>
      %17 = arith.truncf %16 : vector<8x32xf32> to vector<8x32xbf16>
      %c0_15 = arith.constant 0 : index
      %c0_16 = arith.constant 0 : index
      %18 = vector.load %arg5[%c0_15, %c0_16] : memref<32x64xbf16, #tpu.memory_space<vmem>>, vector<32x64xbf16>
      %cst_17 = arith.constant dense<0.000000e+00> : vector<8x64xf32>
      %19 = tpu.matmul %17, %18, %cst_17 {dimension_numbers = #tpu.dot_dimension_numbers<[1], [0], [0], [1], [0, 0, 1, 1], [], []>} : vector<8x32xbf16>, vector<32x64xbf16>, vector<8x64xf32> -> vector<8x64xf32>
      %c0_18 = arith.constant 0 : index
      %c0_19 = arith.constant 0 : index
      %20 = vector.load %arg6[%c0_18, %c0_19] : memref<1x64xf32, #tpu.memory_space<vmem>>, vector<1x64xf32>
      %21 = vector.broadcast %20 : vector<1x64xf32> to vector<8x64xf32>
      %22 = arith.addf %19, %21 : vector<8x64xf32>
      %cst_20 = arith.constant 5.000000e-01 : f32
      %23 = vector.broadcast %cst_20 : f32 to vector<8x64xf32>
      %24 = arith.mulf %23, %22 : vector<8x64xf32>
      %cst_21 = arith.constant 0.707106769 : f32
      %25 = vector.broadcast %cst_21 : f32 to vector<8x64xf32>
      %26 = arith.mulf %22, %25 : vector<8x64xf32>
      %27 = math.erf %26 : vector<8x64xf32>
      %cst_22 = arith.constant 1.000000e+00 : f32
      %28 = vector.broadcast %cst_22 : f32 to vector<8x64xf32>
      %29 = arith.addf %28, %27 : vector<8x64xf32>
      %30 = arith.mulf %24, %29 : vector<8x64xf32>
      %cst_23 = arith.constant dense<0.000000e+00> : vector<8xf32>
      %31 = vector.multi_reduction <add>, %30, %cst_23 [1] : vector<8x64xf32> to vector<8xf32>
      %32 = vector.shape_cast %31 : vector<8xf32> to vector<8x1xf32>
      %cst_24 = arith.constant 6.400000e+01 : f32
      %33 = vector.broadcast %cst_24 : f32 to vector<8x1xf32>
      %34 = arith.divf %32, %33 : vector<8x1xf32>
      %35 = arith.mulf %30, %30 : vector<8x64xf32>
      %cst_25 = arith.constant dense<0.000000e+00> : vector<8xf32>
      %36 = vector.multi_reduction <add>, %35, %cst_25 [1] : vector<8x64xf32> to vector<8xf32>
      %37 = vector.shape_cast %36 : vector<8xf32> to vector<8x1xf32>
      %cst_26 = arith.constant 6.400000e+01 : f32
      %38 = vector.broadcast %cst_26 : f32 to vector<8x1xf32>
      %39 = arith.divf %37, %38 : vector<8x1xf32>
      %40 = arith.mulf %34, %34 : vector<8x1xf32>
      %41 = arith.subf %39, %40 : vector<8x1xf32>
      %cst_27 = arith.constant 0.000000e+00 : f32
      %42 = vector.broadcast %cst_27 : f32 to vector<8x1xf32>
      %43 = arith.maximumf %41, %42 : vector<8x1xf32>
      %44 = vector.broadcast %34 : vector<8x1xf32> to vector<8x64xf32>
      %45 = arith.subf %30, %44 : vector<8x64xf32>
      %cst_28 = arith.constant 9.99999996E-13 : f32
      %46 = vector.broadcast %cst_28 : f32 to vector<8x1xf32>
      %47 = arith.addf %43, %46 : vector<8x1xf32>
      %48 = math.rsqrt %47 : vector<8x1xf32>
      %49 = vector.broadcast %48 : vector<8x1xf32> to vector<8x64xf32>
      %50 = arith.mulf %45, %49 : vector<8x64xf32>
      %c0_29 = arith.constant 0 : index
      %c0_30 = arith.constant 0 : index
      %51 = vector.load %arg7[%c0_29, %c0_30] : memref<1x64xf32, #tpu.memory_space<vmem>>, vector<1x64xf32>
      %52 = vector.broadcast %51 : vector<1x64xf32> to vector<8x64xf32>
      %53 = arith.mulf %50, %52 : vector<8x64xf32>
      %c0_31 = arith.constant 0 : index
      %c0_32 = arith.constant 0 : index
      %54 = vector.load %arg8[%c0_31, %c0_32] : memref<1x64xf32, #tpu.memory_space<vmem>>, vector<1x64xf32>
      %55 = vector.broadcast %54 : vector<1x64xf32> to vector<8x64xf32>
      %56 = arith.addf %53, %55 : vector<8x64xf32>
      %57 = arith.truncf %56 : vector<8x64xf32> to vector<8x64xbf16>
      %c0_33 = arith.constant 0 : index
      %c0_34 = arith.constant 0 : index
      %58 = vector.load %arg12[%c0_33, %c0_34] : memref<8x64xbf16, #tpu.memory_space<vmem>>, vector<8x64xbf16>
      tpu.vector_store %arg12[%c0_33, %c0_34], %57 {strides = array<i32>} : memref<8x64xbf16, #tpu.memory_space<vmem>>, vector<8x64xbf16>,
    } else {
    }
    %c0 = arith.constant 0 : index
    %c0_1 = arith.constant 0 : index
    %3 = vector.load %arg12[%c0, %c0_1] : memref<8x64xbf16, #tpu.memory_space<vmem>>, vector<8x64xbf16>
    %c0_2 = arith.constant 0 : index
    %c0_3 = arith.constant 0 : index
    %4 = vector.load %arg9[%c0_2, %c0_3] : memref<64x128xbf16, #tpu.memory_space<vmem>>, vector<64x128xbf16>
    %cst = arith.constant dense<0.000000e+00> : vector<8x128xf32>
    %5 = tpu.matmul %3, %4, %cst {dimension_numbers = #tpu.dot_dimension_numbers<[1], [0], [0], [1], [0, 0, 1, 1], [], []>} : vector<8x64xbf16>, vector<64x128xbf16>, vector<8x128xf32> -> vector<8x128xf32>
    %c0_4 = arith.constant 0 : index
    %c0_5 = arith.constant 0 : index
    %6 = vector.load %arg10[%c0_4, %c0_5] : memref<1x128xf32, #tpu.memory_space<vmem>>, vector<1x128xf32>
    %7 = vector.broadcast %6 : vector<1x128xf32> to vector<8x128xf32>
    %8 = arith.addf %5, %7 : vector<8x128xf32>
    %c0_6 = arith.constant 0 : index
    %c0_7 = arith.constant 0 : index
    %9 = vector.load %arg11[%c0_6, %c0_7] : memref<8x128xf32, #tpu.memory_space<vmem>>, vector<8x128xf32>
    tpu.vector_store %arg11[%c0_6, %c0_7], %8 {strides = array<i32>} : memref<8x128xf32, #tpu.memory_space<vmem>>, vector<8x128xf32>,
    return
  }
  func.func @transform_0(%arg0: i32, %arg1: i32) -> (i32, i32) {
    %c0_i32 = arith.constant 0 : i32
    %c0_i32_0 = arith.constant 0 : i32
    return %arg0, %c0_i32 : i32, i32
  }
  func.func @transform_1(%arg0: i32, %arg1: i32) -> (i32, i32) {
    %c0_i32 = arith.constant 0 : i32
    %c0_i32_0 = arith.constant 0 : i32
    %c0_i32_1 = arith.constant 0 : i32
    return %c0_i32, %c0_i32_0 : i32, i32
  }
  func.func @transform_2(%arg0: i32, %arg1: i32) -> (i32, i32) {
    %c0_i32 = arith.constant 0 : i32
    %c0_i32_0 = arith.constant 0 : i32
    %c0_i32_1 = arith.constant 0 : i32
    return %c0_i32, %c0_i32_0 : i32, i32
  }
  func.func @transform_3(%arg0: i32, %arg1: i32) -> (i32, i32) {
    %c0_i32 = arith.constant 0 : i32
    %c0_i32_0 = arith.constant 0 : i32
    %c0_i32_1 = arith.constant 0 : i32
    return %c0_i32, %c0_i32_0 : i32, i32
  }
  func.func @transform_4(%arg0: i32, %arg1: i32) -> (i32, i32) {
    %c0_i32 = arith.constant 0 : i32
    %c0_i32_0 = arith.constant 0 : i32
    %c0_i32_1 = arith.constant 0 : i32
    return %c0_i32, %c0_i32_0 : i32, i32
  }
  func.func @transform_5(%arg0: i32, %arg1: i32) -> (i32, i32) {
    %c0_i32 = arith.constant 0 : i32
    %c0_i32_0 = arith.constant 0 : i32
    %c0_i32_1 = arith.constant 0 : i32
    return %c0_i32, %c0_i32_0 : i32, i32
  }
  func.func @transform_6(%arg0: i32, %arg1: i32) -> (i32, i32) {
    %c0_i32 = arith.constant 0 : i32
    %c0_i32_0 = arith.constant 0 : i32
    %c0_i32_1 = arith.constant 0 : i32
    return %c0_i32, %c0_i32_0 : i32, i32
  }
  func.func @transform_7(%arg0: i32, %arg1: i32) -> (i32, i32) {
    %c0_i32 = arith.constant 0 : i32
    %c0_i32_0 = arith.constant 0 : i32
    %c0_i32_1 = arith.constant 0 : i32
    return %c0_i32, %c0_i32_0 : i32, i32
  }
  func.func @transform_8(%arg0: i32, %arg1: i32) -> (i32, i32) {
    %c0_i32 = arith.constant 0 : i32
    %c0_i32_0 = arith.constant 0 : i32
    %c0_i32_1 = arith.constant 0 : i32
    return %c0_i32, %c0_i32_0 : i32, i32
  }
  func.func @transform_9(%arg0: i32, %arg1: i32) -> (i32, i32) {
    %c0_i32 = arith.constant 0 : i32
    return %arg0, %arg1 : i32, i32
  }
}

</mosaic_0001>

<bundles_post_ra>
// kernel: tpu_custom_call.1
= control target key start
LH: loop header
LB: loop body
LE: loop exit
PB: predicated region body
PF: predicated region fallthrough
CT: control target
= control target key end

     0   :  { %s552_s0 = inlined_call_operand.vmem [shape: bf16[8,128], index: 0, kind: input, shape index: {}]   ;;  %s553_s1 = inlined_call_operand.vmem [shape: bf16[128,32], index: 1, kind: input, shape index: {}]   ;;  %s554_s2 = inlined_call_operand.vmem [shape: f32[1,32], index: 2, kind: input, shape index: {}]   ;;  %s555_s3 = inlined_call_operand.vmem [shape: bf16[32,64], index: 3, kind: input, shape index: {}]   ;;  %s556_s4 = inlined_call_operand.vmem [shape: f32[1,64], index: 4, kind: input, shape index: {}]   ;;  %s557_s5 = inlined_call_operand.vmem [shape: f32[1,64], index: 5, kind: input, shape index: {}]   ;;  %s558_s6 = inlined_call_operand.vmem [shape: f32[1,64], index: 6, kind: input, shape index: {}]   ;;  %s559_s7 = inlined_call_operand.vmem [shape: bf16[64,128], index: 7, kind: input, shape index: {}]   ;;  %s560_s8 = inlined_call_operand.vmem [shape: f32[1,128], index: 8, kind: input, shape index: {}]   ;;  %s561_s9 = inlined_call_operand.hbm [shape: f32[8,128], index: 9, kind: output, shape index: {}]  }
   0x1   :  { %v386_v0 = vld [vmem:[%s553_s1 + $0x38] sm:$0xff]  ;;  %v385_v1 = vld [vmem:[%s553_s1 + $0x30] sm:$0xff] }
   0x2   :  { %107 = vmatpush.bf16.msra.mxu0 %v386_v0 }
   0x3   :  { %14 = vsyncpa [#allocation4], 0  ;;  %v384_v2 = vld [vmem:[%s553_s1 + $0x28] sm:$0xff]  ;;  %v383_v3 = vld [vmem:[%s553_s1 + $0x20] sm:$0xff]  ;;  %vm142_vm0 = vcmask 261120   ;;  %vm203_vm5 = vcmask 523264  }
   0x4   :  { %v382_v4 = vld [vmem:[%s553_s1 + $0x18] sm:$0xff]  ;;  %v381_v5 = vld [vmem:[%s553_s1 + $0x10] sm:$0xff]  ;;  %v380_v6 = vld [vmem:[%s553_s1 + $0x8] sm:$0xff]  ;;  %v434_v63 = vmov 64.0   ;;  %vm247_vm10 = vcmask 519168   ;;  %s311_s25 = sshll.u32 %s561_s9, 4  ;;  %s312_s25 = int_to_ptr.hbm [resolvable:$true] %s311_s25 }
   0x5   :  { %v379_v7 = vld [vmem:[%s553_s1] sm:$0xff]  ;;  %v388_v9 = vld [vmem:[%s555_s3 + $0x8] sm:$0xff] }
   0x6   :  { %108 = vmatpush.bf16.msra.mxu0 %v385_v1  ;;  %v38_v8 = vld [vmem:[%s552_s0] sm:$0xf]  ;;  %152 = vmatpush.bf16.msra.mxu1 %v388_v9  ;;  %v391_v9 = vld [vmem:[%s559_s7 + $0x10] sm:$0xff] }
   0x7   :  { %v387_v10 = vld [vmem:[%s555_s3] sm:$0xff] }
   0x8   :  { %v395_v11 = vld [vmem:[%s554_s2] ss:$0 sm:$0xff] }
   0x9   :  { %v396_v17 = vld [vmem:[%s556_s4] ss:$0 sm:$0xff] }
   0xa   :  { %109 = vmatpush.bf16.msra.mxu0 %v384_v2  ;;  %153 = vmatpush.bf16.msra.mxu1 %v387_v10 }
   0xe   :  { %110 = vmatpush.bf16.msra.mxu0 %v383_v3 }
  0x12   :  { %111 = vmatpush.bf16.msra.mxu0 %v382_v4 }
  0x16   :  { %112 = vmatpush.bf16.msra.mxu0 %v381_v5 }
  0x1a   :  { %113 = vmatpush.bf16.msra.mxu0 %v380_v6 }
  0x1e   :  { %114 = vmatpush.bf16.msra.mxu0 %v379_v7  ;;  %v392_v7 = vld [vmem:[%s559_s7 + $0x18] sm:$0xff] }
  0x1f   :  { %294 = vmatpush.bf16.msra.mxu2 %v392_v7 }
  0x21   :  { %115 = vmatmul.bf16.vlgmr.msra.gmra.mxu0 %v38_v8 }
  0x23   :  { %295 = vmatpush.bf16.msra.mxu2 %v391_v9 }
  0x9e   :  { %v116_v12 = vpop.f32.mrf.mxu0 }
  0x9f   :  { %v117_v13 = vadd.f32 %v395_v11, %v116_v12 }
  0xa1   :  { %400 = vtanh.f32 %v117_v13 }
  0xa6   :  { %v118_v14 = vpop.f32.mrf.mxu0 }
  0xa7   :  { %v401_v15 = vpop.eup %400  ;;  %v390_v14 = vld [vmem:[%s559_s7 + $0x8] sm:$0xff] }
  0xa8   :  { %v121_v16 = vpack.c.bf16 %v401_v15, %v401_v15  ;;  %296 = vmatpush.bf16.msra.mxu2 %v390_v14 }
  0xaa   :  { %360 = vmatmul.msk.bf16.vlgmr.msra.gmra.mxu1 %vm142_vm0, %v121_v16  ;;  %v389_v16 = vld [vmem:[%s559_s7] sm:$0xff] }
  0xac   :  { %297 = vmatpush.bf16.msra.mxu2 %v389_v16 }
 0x127   :  { %v155_v18 = vpop.f32.mrf.mxu1 }
 0x128   :  { %v156_v19 = vadd.f32 %v396_v17, %v155_v18 }
 0x12a   :  { %v160_v20 = vmul.f32 0.70710677, %v156_v19  ;;  %v159_v57 = vmul.f32 0.5, %v156_v19 }
 0x12c   :  { %v161_v21 = vmul.f32 %v160_v20, %v160_v20 }
 0x12e   :  { %v162_v22 = vmin.f32 %v161_v21, 16.0 }
 0x12f   :  { %v157_v23 = vpop.f32.mrf.mxu1 }
 0x130   :  { %v163_v24 = vmul.f32 2.1237322e-06, %v162_v22  ;;  %v174_v25 = vmul.f32 3.8918573e-05, %v162_v22 }
 0x132   :  { %v164_v26 = vadd.f32 0.00028619796, %v163_v24  ;;  %v175_v27 = vadd.f32 0.001143296, %v174_v25  ;;  %v397_v25 = vld [vmem:[%s557_s5] ss:$0 sm:$0xff] }
 0x133   :  { %s435_s5 = smov [#allocation3]  }
 0x134   :  { %v165_v28 = vmul.f32 %v164_v26, %v162_v22  ;;  %v176_v29 = vmul.f32 %v175_v27, %v162_v22  ;;  %v398_v27 = vld [vmem:[%s558_s6] ss:$0 sm:$0xff]  ;;  %s309_s22 = sshll.u32 %s435_s5, 4  ;;  %s310_s22 = int_to_ptr.vmem [resolvable:$true] %s309_s22 }
 0x136   :  { %v177_v30 = vadd.f32 0.014752088, %v176_v29  ;;  %v166_v31 = vadd.f32 0.0036580483, %v165_v28 }
 0x138   :  { %v178_v32 = vmul.f32 %v177_v30, %v162_v22  ;;  %v167_v34 = vmul.f32 %v166_v31, %v162_v22 }
 0x13a   :  { %v179_v33 = vadd.f32 0.112945676, %v178_v32  ;;  %v168_v37 = vadd.f32 0.05243302, %v167_v34 }
 0x13c   :  { %v180_v35 = vmul.f32 %v179_v33, %v162_v22  ;;  %v169_v40 = vmul.f32 %v168_v37, %v162_v22  ;;  %v399_v33 = vld [vmem:[%s560_s8] ss:$0 sm:$0xff] }
 0x13e   :  { %v181_v36 = vadd.f32 0.4994258, %v180_v35  ;;  %v170_v41 = vadd.f32 0.18741608, %v169_v40 }
 0x140   :  { %v182_v38 = vmul.f32 %v181_v36, %v162_v22  ;;  %v171_v43 = vmul.f32 %v170_v41, %v162_v22 }
 0x142   :  { %v183_v39 = vadd.f32 1.0, %v182_v38  ;;  %v172_v47 = vadd.f32 1.1283791, %v171_v43 }
 0x144   :  { %402 = vrcp.f32 %v183_v39  ;;  %v195_v46 = vand.u32 2147483648, %v183_v39  ;;  %v193_v49 = vand.u32 2147483647, %v183_v39  ;;  %vm189_vm2 = vweird.f32 %v183_v39 }
 0x145   :  { %v173_v52 = vmul.f32 %v172_v47, %v160_v20  ;;  %404 = vrcp.f32 %v434_v63 }
 0x146   :  { %v196_v51 = vor.u32 1.1754944e-38, %v195_v46  ;;  %vm194_vm4 = vcmp.eq.f32.partialorder %v193_v49, 8.507059e+37 }
 0x14a   :  { %v403_v42 = vpop.eup %402 }
 0x14b   :  { %v185_v44 = vmul.f32 %v403_v42, %v183_v39  ;;  %vm190_vm1 = vweird.f32 %v403_v42  ;;  %v405_v0 = vpop.eup %404 }
 0x14c   :  { %vm191_vm3 = vmor %vm189_vm2, %vm190_vm1  ;;  %v208_v1 = vmul.f32 64.0, %v405_v0  ;;  %vm212_vm6 = vweird.f32 %v405_v0 }
 0x14d   :  { %v186_v45 = vsub.f32 1.0, %v185_v44 }
 0x14e   :  { %v209_v2 = vsub.f32 1.0, %v208_v1 }
 0x14f   :  { %v187_v48 = vmul.f32 %v403_v42, %v186_v45 }
 0x150   :  { %v210_v3 = vmul.f32 %v405_v0, %v209_v2 }
 0x151   :  { %v188_v50 = vadd.f32 %v403_v42, %v187_v48 }
 0x152   :  { %v211_v4 = vadd.f32 %v405_v0, %v210_v3 }
 0x153   :  { %v192_v53 = vsel %vm191_vm3, %v403_v42, %v188_v50 }
 0x154   :  { %v197_v54 = vsel %vm194_vm4, %v196_v51, %v192_v53  ;;  %v213_v6 = vsel %vm212_vm6, %v405_v0, %v211_v4 }
 0x155   :  { %v198_v55 = vmul.f32 %v197_v54, %v173_v52 }
 0x157   :  { %v361_v56 = vclamps-f32 %v198_v55, 1.0 }
 0x159   :  { %v201_v58 = vadd.f32 1.0, %v361_v56 }
 0x15b   :  { %v202_v59 = vmul.f32 %v201_v58, %v159_v57 }
 0x15d   :  { %v204_v60 = vsel %vm203_vm5, %v202_v59, 0.0  ;;  %v215_v61 = vmul.f32 %v202_v59, %v202_v59 }
 0x15e   :  { %205 = vadd.xlane.f32.xlu0 %v204_v60 }
 0x15f   :  { %v216_v62 = vsel %vm203_vm5, %v215_v61, 0.0 }
 0x166   :  { %217 = vadd.xlane.f32.xlu0 %v216_v62 }
 0x1d1   :  { %v206_v5 = vpop.xlane.xlu0 %205 }
 0x1d2   :  { %v214_v8 = vmul.f32 %v213_v6, %v206_v5 }
 0x1d4   :  { %v220_v11 = vmul.f32 %v214_v8, %v214_v8  ;;  %v223_v24 = vsub.f32 %v202_v59, %v214_v8 }
 0x1d9   :  { %v218_v10 = vpop.xlane.xlu0 %217 }
 0x1da   :  { %v219_v12 = vmul.f32 %v218_v10, %v213_v6 }
 0x1dc   :  { %v221_v13 = vsub.f32 %v219_v12, %v220_v11 }
 0x1de   :  { %v222_v15 = vmax.f32 %v221_v13, 0.0 }
 0x1e0   :  { %v224_v17 = vadd.f32 1e-12, %v222_v15 }
 0x1e2   :  { %406 = vrsqrt.f32 %v224_v17  ;;  %vm231_vm8 = vweird.f32 %v224_v17 }
 0x1e8   :  { %v407_v18 = vpop.eup %406 }
 0x1e9   :  { %v226_v19 = vmul.f32 %v407_v18, %v224_v17  ;;  %vm232_vm7 = vweird.f32 %v407_v18 }
 0x1ea   :  { %vm233_vm9 = vmor %vm231_vm8, %vm232_vm7 }
 0x1eb   :  { %v227_v20 = vmul.f32 %v407_v18, %v226_v19 }
 0x1ed   :  { %v228_v21 = vmul.f32 0.5, %v227_v20 }
 0x1ef   :  { %v229_v22 = vsub.f32 1.5, %v228_v21 }
 0x1f1   :  { %v230_v23 = vmul.f32 %v407_v18, %v229_v22 }
 0x1f3   :  { %v234_v26 = vsel %vm233_vm9, %v407_v18, %v230_v23 }
 0x1f4   :  { %v235_v28 = vmul.f32 %v234_v26, %v223_v24 }
 0x1f6   :  { %v240_v29 = vmul.f32 %v397_v25, %v235_v28 }
 0x1f8   :  { %v245_v30 = vadd.f32 %v398_v27, %v240_v29 }
 0x1fa   :  { %v246_v31 = vpack.c.bf16 %v245_v30, %v245_v30 }
 0x1fc   :  { %248 = vst.msk [vmem:[#allocation2] sm:$0xf] %vm247_vm10, %v246_v31 }
 0x203   :  { %v249_v32 = vld [vmem:[#allocation2] sm:$0xf] }
 0x204   :  { %378 = vmatmul.msk.bf16.vlgmr.msra.gmra.mxu2 %vm203_vm5, %v249_v32 }
 0x287   :  { %v299_v34 = vpop.f32.mrf.mxu2 }
 0x288   :  { %v300_v35 = vadd.f32 %v399_v33, %v299_v34 }
 0x28a   :  { %303 = vst [vmem:[#allocation3] sm:$0xff] %v300_v35 }
 0x28b   :  { %314 = dma.vmem_to_hbm [thread:$0]  %s310_s22, 128, %s312_s25, [#allocation4]  }
 0x28f   :  { %v301_v36 = vpop.f32.mrf.mxu2 }
 0x290   :  { %432 = dma.done.wait [#allocation4], 128  }
 0x291   :  { %433 = vsyncadd [#allocation4], 4294967168 }
 0x292   :  { %319 = vsyncpa [#allocation4], 1 }

// kernel: tpu_custom_call.1
= control target key start
LH: loop header
LB: loop body
LE: loop exit
PB: predicated region body
PF: predicated region fallthrough
CT: control target
= control target key end

     0   :  { %s552_s0 = inlined_call_operand.vmem [shape: bf16[8,128], index: 0, kind: input, shape index: {}]   ;;  %s553_s1 = inlined_call_operand.vmem [shape: bf16[128,32], index: 1, kind: input, shape index: {}]   ;;  %s554_s2 = inlined_call_operand.vmem [shape: f32[1,32], index: 2, kind: input, shape index: {}]   ;;  %s555_s3 = inlined_call_operand.vmem [shape: bf16[32,64], index: 3, kind: input, shape index: {}]   ;;  %s556_s4 = inlined_call_operand.vmem [shape: f32[1,64], index: 4, kind: input, shape index: {}]   ;;  %s557_s5 = inlined_call_operand.vmem [shape: f32[1,64], index: 5, kind: input, shape index: {}]   ;;  %s558_s6 = inlined_call_operand.vmem [shape: f32[1,64], index: 6, kind: input, shape index: {}]   ;;  %s559_s7 = inlined_call_operand.vmem [shape: bf16[64,128], index: 7, kind: input, shape index: {}]   ;;  %s560_s8 = inlined_call_operand.vmem [shape: f32[1,128], index: 8, kind: input, shape index: {}]   ;;  %s561_s9 = inlined_call_operand.hbm [shape: f32[8,128], index: 9, kind: output, shape index: {}]  }
   0x1   :  { %v386_v0 = vld [vmem:[%s553_s1 + $0x38] sm:$0xff]  ;;  %v385_v1 = vld [vmem:[%s553_s1 + $0x30] sm:$0xff] }
   0x2   :  { %107 = vmatpush.bf16.msra.mxu0 %v386_v0 }
   0x3   :  { %14 = vsyncpa [#allocation4], 0  ;;  %v384_v2 = vld [vmem:[%s553_s1 + $0x28] sm:$0xff]  ;;  %v383_v3 = vld [vmem:[%s553_s1 + $0x20] sm:$0xff]  ;;  %vm142_vm0 = vcmask 261120   ;;  %vm203_vm5 = vcmask 523264  }
   0x4   :  { %v382_v4 = vld [vmem:[%s553_s1 + $0x18] sm:$0xff]  ;;  %v381_v5 = vld [vmem:[%s553_s1 + $0x10] sm:$0xff]  ;;  %v380_v6 = vld [vmem:[%s553_s1 + $0x8] sm:$0xff]  ;;  %v434_v63 = vmov 64.0   ;;  %vm247_vm10 = vcmask 519168   ;;  %s311_s25 = sshll.u32 %s561_s9, 4  ;;  %s312_s25 = int_to_ptr.hbm [resolvable:$true] %s311_s25 }
   0x5   :  { %v379_v7 = vld [vmem:[%s553_s1] sm:$0xff]  ;;  %v388_v9 = vld [vmem:[%s555_s3 + $0x8] sm:$0xff] }
   0x6   :  { %108 = vmatpush.bf16.msra.mxu0 %v385_v1  ;;  %v38_v8 = vld [vmem:[%s552_s0] sm:$0xf]  ;;  %152 = vmatpush.bf16.msra.mxu1 %v388_v9  ;;  %v391_v9 = vld [vmem:[%s559_s7 + $0x10] sm:$0xff] }
   0x7   :  { %v387_v10 = vld [vmem:[%s555_s3] sm:$0xff] }
   0x8   :  { %v395_v11 = vld [vmem:[%s554_s2] ss:$0 sm:$0xff] }
   0x9   :  { %v396_v17 = vld [vmem:[%s556_s4] ss:$0 sm:$0xff] }
   0xa   :  { %109 = vmatpush.bf16.msra.mxu0 %v384_v2  ;;  %153 = vmatpush.bf16.msra.mxu1 %v387_v10 }
   0xe   :  { %110 = vmatpush.bf16.msra.mxu0 %v383_v3 }
  0x12   :  { %111 = vmatpush.bf16.msra.mxu0 %v382_v4 }
  0x16   :  { %112 = vmatpush.bf16.msra.mxu0 %v381_v5 }
  0x1a   :  { %113 = vmatpush.bf16.msra.mxu0 %v380_v6 }
  0x1e   :  { %114 = vmatpush.bf16.msra.mxu0 %v379_v7  ;;  %v392_v7 = vld [vmem:[%s559_s7 + $0x18] sm:$0xff] }
  0x1f   :  { %294 = vmatpush.bf16.msra.mxu2 %v392_v7 }
  0x21   :  { %115 = vmatmul.bf16.vlgmr.msra.gmra.mxu0 %v38_v8 }
  0x23   :  { %295 = vmatpush.bf16.msra.mxu2 %v391_v9 }
  0x9e   :  { %v116_v12 = vpop.f32.mrf.mxu0 }
  0x9f   :  { %v117_v13 = vadd.f32 %v395_v11, %v116_v12 }
  0xa1   :  { %400 = vtanh.f32 %v117_v13 }
  0xa6   :  { %v118_v14 = vpop.f32.mrf.mxu0 }
  0xa7   :  { %v401_v15 = vpop.eup %400  ;;  %v390_v14 = vld [vmem:[%s559_s7 + $0x8] sm:$0xff] }
  0xa8   :  { %v121_v16 = vpack.c.bf16 %v401_v15, %v401_v15  ;;  %296 = vmatpush.bf16.msra.mxu2 %v390_v14 }
  0xaa   :  { %360 = vmatmul.msk.bf16.vlgmr.msra.gmra.mxu1 %vm142_vm0, %v121_v16  ;;  %v389_v16 = vld [vmem:[%s559_s7] sm:$0xff] }
  0xac   :  { %297 = vmatpush.bf16.msra.mxu2 %v389_v16 }
 0x127   :  { %v155_v18 = vpop.f32.mrf.mxu1 }
 0x128   :  { %v156_v19 = vadd.f32 %v396_v17, %v155_v18 }
 0x12a   :  { %v160_v20 = vmul.f32 0.70710677, %v156_v19  ;;  %v159_v57 = vmul.f32 0.5, %v156_v19 }
 0x12c   :  { %v161_v21 = vmul.f32 %v160_v20, %v160_v20 }
 0x12e   :  { %v162_v22 = vmin.f32 %v161_v21, 16.0 }
 0x12f   :  { %v157_v23 = vpop.f32.mrf.mxu1 }
 0x130   :  { %v163_v24 = vmul.f32 2.1237322e-06, %v162_v22  ;;  %v174_v25 = vmul.f32 3.8918573e-05, %v162_v22 }
 0x132   :  { %v164_v26 = vadd.f32 0.00028619796, %v163_v24  ;;  %v175_v27 = vadd.f32 0.001143296, %v174_v25  ;;  %v397_v25 = vld [vmem:[%s557_s5] ss:$0 sm:$0xff] }
 0x133   :  { %s435_s5 = smov [#allocation3]  }
 0x134   :  { %v165_v28 = vmul.f32 %v164_v26, %v162_v22  ;;  %v176_v29 = vmul.f32 %v175_v27, %v162_v22  ;;  %v398_v27 = vld [vmem:[%s558_s6] ss:$0 sm:$0xff]  ;;  %s309_s22 = sshll.u32 %s435_s5, 4  ;;  %s310_s22 = int_to_ptr.vmem [resolvable:$true] %s309_s22 }
 0x136   :  { %v177_v30 = vadd.f32 0.014752088, %v176_v29  ;;  %v166_v31 = vadd.f32 0.0036580483, %v165_v28 }
 0x138   :  { %v178_v32 = vmul.f32 %v177_v30, %v162_v22  ;;  %v167_v34 = vmul.f32 %v166_v31, %v162_v22 }
 0x13a   :  { %v179_v33 = vadd.f32 0.112945676, %v178_v32  ;;  %v168_v37 = vadd.f32 0.05243302, %v167_v34 }
 0x13c   :  { %v180_v35 = vmul.f32 %v179_v33, %v162_v22  ;;  %v169_v40 = vmul.f32 %v168_v37, %v162_v22  ;;  %v399_v33 = vld [vmem:[%s560_s8] ss:$0 sm:$0xff] }
 0x13e   :  { %v181_v36 = vadd.f32 0.4994258, %v180_v35  ;;  %v170_v41 = vadd.f32 0.18741608, %v169_v40 }
 0x140   :  { %v182_v38 = vmul.f32 %v181_v36, %v162_v22  ;;  %v171_v43 = vmul.f32 %v170_v41, %v162_v22 }
 0x142   :  { %v183_v39 = vadd.f32 1.0, %v182_v38  ;;  %v172_v47 = vadd.f32 1.1283791, %v171_v43 }
 0x144   :  { %402 = vrcp.f32 %v183_v39  ;;  %v195_v46 = vand.u32 2147483648, %v183_v39  ;;  %v193_v49 = vand.u32 2147483647, %v183_v39  ;;  %vm189_vm2 = vweird.f32 %v183_v39 }
 0x145   :  { %v173_v52 = vmul.f32 %v172_v47, %v160_v20  ;;  %404 = vrcp.f32 %v434_v63 }
 0x146   :  { %v196_v51 = vor.u32 1.1754944e-38, %v195_v46  ;;  %vm194_vm4 = vcmp.eq.f32.partialorder %v193_v49, 8.507059e+37 }
 0x14a   :  { %v403_v42 = vpop.eup %402 }
 0x14b   :  { %v185_v44 = vmul.f32 %v403_v42, %v183_v39  ;;  %vm190_vm1 = vweird.f32 %v403_v42  ;;  %v405_v0 = vpop.eup %404 }
 0x14c   :  { %vm191_vm3 = vmor %vm189_vm2, %vm190_vm1  ;;  %v208_v1 = vmul.f32 64.0, %v405_v0  ;;  %vm212_vm6 = vweird.f32 %v405_v0 }
 0x14d   :  { %v186_v45 = vsub.f32 1.0, %v185_v44 }
 0x14e   :  { %v209_v2 = vsub.f32 1.0, %v208_v1 }
 0x14f   :  { %v187_v48 = vmul.f32 %v403_v42, %v186_v45 }
 0x150   :  { %v210_v3 = vmul.f32 %v405_v0, %v209_v2 }
 0x151   :  { %v188_v50 = vadd.f32 %v403_v42, %v187_v48 }
 0x152   :  { %v211_v4 = vadd.f32 %v405_v0, %v210_v3 }
 0x153   :  { %v192_v53 = vsel %vm191_vm3, %v403_v42, %v188_v50 }
 0x154   :  { %v197_v54 = vsel %vm194_vm4, %v196_v51, %v192_v53  ;;  %v213_v6 = vsel %vm212_vm6, %v405_v0, %v211_v4 }
 0x155   :  { %v198_v55 = vmul.f32 %v197_v54, %v173_v52 }
 0x157   :  { %v361_v56 = vclamps-f32 %v198_v55, 1.0 }
 0x159   :  { %v201_v58 = vadd.f32 1.0, %v361_v56 }
 0x15b   :  { %v202_v59 = vmul.f32 %v201_v58, %v159_v57 }
 0x15d   :  { %v204_v60 = vsel %vm203_vm5, %v202_v59, 0.0  ;;  %v215_v61 = vmul.f32 %v202_v59, %v202_v59 }
 0x15e   :  { %205 = vadd.xlane.f32.xlu0 %v204_v60 }
 0x15f   :  { %v216_v62 = vsel %vm203_vm5, %v215_v61, 0.0 }
 0x166   :  { %217 = vadd.xlane.f32.xlu0 %v216_v62 }
 0x1d1   :  { %v206_v5 = vpop.xlane.xlu0 %205 }
 0x1d2   :  { %v214_v8 = vmul.f32 %v213_v6, %v206_v5 }
 0x1d4   :  { %v220_v11 = vmul.f32 %v214_v8, %v214_v8  ;;  %v223_v24 = vsub.f32 %v202_v59, %v214_v8 }
 0x1d9   :  { %v218_v10 = vpop.xlane.xlu0 %217 }
 0x1da   :  { %v219_v12 = vmul.f32 %v218_v10, %v213_v6 }
 0x1dc   :  { %v221_v13 = vsub.f32 %v219_v12, %v220_v11 }
 0x1de   :  { %v222_v15 = vmax.f32 %v221_v13, 0.0 }
 0x1e0   :  { %v224_v17 = vadd.f32 1e-12, %v222_v15 }
 0x1e2   :  { %406 = vrsqrt.f32 %v224_v17  ;;  %vm231_vm8 = vweird.f32 %v224_v17 }
 0x1e8   :  { %v407_v18 = vpop.eup %406 }
 0x1e9   :  { %v226_v19 = vmul.f32 %v407_v18, %v224_v17  ;;  %vm232_vm7 = vweird.f32 %v407_v18 }
 0x1ea   :  { %vm233_vm9 = vmor %vm231_vm8, %vm232_vm7 }
 0x1eb   :  { %v227_v20 = vmul.f32 %v407_v18, %v226_v19 }
 0x1ed   :  { %v228_v21 = vmul.f32 0.5, %v227_v20 }
 0x1ef   :  { %v229_v22 = vsub.f32 1.5, %v228_v21 }
 0x1f1   :  { %v230_v23 = vmul.f32 %v407_v18, %v229_v22 }
 0x1f3   :  { %v234_v26 = vsel %vm233_vm9, %v407_v18, %v230_v23 }
 0x1f4   :  { %v235_v28 = vmul.f32 %v234_v26, %v223_v24 }
 0x1f6   :  { %v240_v29 = vmul.f32 %v397_v25, %v235_v28 }
 0x1f8   :  { %v245_v30 = vadd.f32 %v398_v27, %v240_v29 }
 0x1fa   :  { %v246_v31 = vpack.c.bf16 %v245_v30, %v245_v30 }
 0x1fc   :  { %248 = vst.msk [vmem:[#allocation2] sm:$0xf] %vm247_vm10, %v246_v31 }
 0x203   :  { %v249_v32 = vld [vmem:[#allocation2] sm:$0xf] }
 0x204   :  { %378 = vmatmul.msk.bf16.vlgmr.msra.gmra.mxu2 %vm203_vm5, %v249_v32 }
 0x287   :  { %v299_v34 = vpop.f32.mrf.mxu2 }
 0x288   :  { %v300_v35 = vadd.f32 %v399_v33, %v299_v34 }
 0x28a   :  { %303 = vst [vmem:[#allocation3] sm:$0xff] %v300_v35 }
 0x28b   :  { %314 = dma.vmem_to_hbm [thread:$0]  %s310_s22, 128, %s312_s25, [#allocation4]  }
 0x28f   :  { %v301_v36 = vpop.f32.mrf.mxu2 }
 0x290   :  { %432 = dma.done.wait [#allocation4], 128  }
 0x291   :  { %433 = vsyncadd [#allocation4], 4294967168 }
 0x292   :  { %319 = vsyncpa [#allocation4], 1 }

</bundles_post_ra>
